<compile_context>
chip_gen: v7x
topology: tpu7x:2x2x1
jax: 0.10.0
libtpu: 0.0.40
codegen_flags: <defaults>
</compile_context>

<pallas_src>
import jax
import jax.numpy as jnp
from jax import lax
from jax.experimental import pallas as pl
from jax.experimental.pallas import tpu as pltpu  # noqa: F401  (TPU backend)

B, N, C = 2, 8, 128       # batch, seq (residues), channel dim c
EPS = 1e-5                # nn.LayerNorm default eps


def _linear_t(x, w, b):
    # x: (M, Cin), w: (Cout, Cin) PyTorch layout  ->  x @ w.T + b
    y = lax.dot_general(x, w, (((1,), (1,)), ((), ())),
                        preferred_element_type=jnp.float32)
    return y + b


def smt_kernel(x_ref, w_ref, v_ref, o_ref):
    c = w_ref.shape[1]
    x = x_ref[...]                                   # (M, C)

    # static, tile-aligned slices of the packed parameter slabs
    w1 = w_ref[0 * c:1 * c, :]
    w2 = w_ref[1 * c:2 * c, :]
    w3 = w_ref[2 * c:3 * c, :]
    b1 = v_ref[0:1, :]
    b2 = v_ref[1:2, :]
    b3 = v_ref[2:3, :]
    ln_w = v_ref[3:4, :]
    ln_b = v_ref[4:5, :]

    h = jnp.maximum(_linear_t(x, w1, b1), 0.0)       # linear_1 + relu
    h = jnp.maximum(_linear_t(h, w2, b2), 0.0)       # linear_2 + relu
    h = _linear_t(h, w3, b3)                         # linear_3
    y = x + h                                        # residual

    mu = jnp.mean(y, axis=-1, keepdims=True)
    var = jnp.mean((y - mu) ** 2, axis=-1, keepdims=True)   # biased var (PyTorch LN)
    o_ref[...] = ((y - mu) * lax.rsqrt(var + EPS) * ln_w + ln_b).astype(o_ref.dtype)


def quant_structure_module_transition(s, params):
    Bn, Nn, Cn = s.shape
    M = Bn * Nn
    x2d = s.reshape(M, Cn)                                          # (B*N, C) lane-dense

    # pack params: one weight slab (3C, C), one vector slab (5, C)
    wslab = jnp.concatenate([params["w1"], params["w2"], params["w3"]], axis=0)
    vslab = jnp.stack([params["b1"], params["b2"], params["b3"],
                       params["ln_w"], params["ln_b"]], axis=0)

    out2d = pl.pallas_call(
        smt_kernel,
        out_shape=jax.ShapeDtypeStruct((M, Cn), jnp.float32),
    )(x2d, wslab, vslab)
    return out2d.reshape(Bn, Nn, Cn)


def reference_forward(s, p):
    """Pure-JAX mirror of the PyTorch forward (quant/dropout disabled)."""
    h = jax.nn.relu(s @ p["w1"].T + p["b1"])
    h = jax.nn.relu(h @ p["w2"].T + p["b2"])
    h = h @ p["w3"].T + p["b3"]
    y = s + h
    mu = y.mean(-1, keepdims=True)
    var = ((y - mu) ** 2).mean(-1, keepdims=True)
    return (y - mu) / jnp.sqrt(var + EPS) * p["ln_w"] + p["ln_b"]


if __name__ == "__main__":
    key = jax.random.PRNGKey(0)
    keys = jax.random.split(key, 9)

    def nrm(k, shape, scale=0.1):
        return jax.random.normal(k, shape, jnp.float32) * scale

    params = {
        "w1": nrm(keys[0], (C, C)),          # linear_1 weight (out, in)
        "b1": nrm(keys[1], (C,)),            # linear_1 bias
        "w2": nrm(keys[2], (C, C)),          # linear_2 weight
        "b2": nrm(keys[3], (C,)),            # linear_2 bias
        "w3": nrm(keys[4], (C, C)),          # linear_3 weight
        "b3": nrm(keys[5], (C,)),            # linear_3 bias
        "ln_w": 1.0 + nrm(keys[6], (C,)),    # LayerNorm weight
        "ln_b": nrm(keys[7], (C,)),          # LayerNorm bias
    }
    s = jax.random.normal(keys[8], (B, N, C), jnp.float32)

    out = quant_structure_module_transition(s, params)
    out = jax.block_until_ready(out)

    ref = reference_forward(s, params)
    assert out.shape == (B, N, C)
    max_err = float(jnp.max(jnp.abs(out - ref)))
    assert jnp.allclose(out, ref, atol=1e-4, rtol=1e-4), f"max_err={max_err}"
    print("KERNEL_OK")
</pallas_src>

<mosaic_0001>
module attributes {stable_mosaic.version = 11 : i64} {
  func.func @smt_kernel(%arg0: memref<16x128xf32, #tpu.memory_space<vmem>>, %arg1: memref<384x128xf32, #tpu.memory_space<vmem>>, %arg2: memref<5x128xf32, #tpu.memory_space<vmem>>, %arg3: memref<16x128xf32, #tpu.memory_space<vmem>>) attributes {dimension_semantics = [], scalar_prefetch = 0 : i64, scratch_operands = 0 : i64, tpu.core_type = #tpu.core_type<tc>} {
    %c0 = arith.constant 0 : index
    %c0_0 = arith.constant 0 : index
    %0 = vector.load %arg0[%c0, %c0_0] : memref<16x128xf32, #tpu.memory_space<vmem>>, vector<16x128xf32>
    %c0_1 = arith.constant 0 : index
    %c0_2 = arith.constant 0 : index
    %1 = vector.load %arg1[%c0_1, %c0_2] : memref<384x128xf32, #tpu.memory_space<vmem>>, vector<128x128xf32>
    %c128 = arith.constant 128 : index
    %c0_3 = arith.constant 0 : index
    %2 = vector.load %arg1[%c128, %c0_3] : memref<384x128xf32, #tpu.memory_space<vmem>>, vector<128x128xf32>
    %c256 = arith.constant 256 : index
    %c0_4 = arith.constant 0 : index
    %3 = vector.load %arg1[%c256, %c0_4] : memref<384x128xf32, #tpu.memory_space<vmem>>, vector<128x128xf32>
    %c0_5 = arith.constant 0 : index
    %c0_6 = arith.constant 0 : index
    %4 = vector.load %arg2[%c0_5, %c0_6] : memref<5x128xf32, #tpu.memory_space<vmem>>, vector<1x128xf32>
    %c1 = arith.constant 1 : index
    %c0_7 = arith.constant 0 : index
    %5 = vector.load %arg2[%c1, %c0_7] : memref<5x128xf32, #tpu.memory_space<vmem>>, vector<1x128xf32>
    %c2 = arith.constant 2 : index
    %c0_8 = arith.constant 0 : index
    %6 = vector.load %arg2[%c2, %c0_8] : memref<5x128xf32, #tpu.memory_space<vmem>>, vector<1x128xf32>
    %c3 = arith.constant 3 : index
    %c0_9 = arith.constant 0 : index
    %7 = vector.load %arg2[%c3, %c0_9] : memref<5x128xf32, #tpu.memory_space<vmem>>, vector<1x128xf32>
    %c4 = arith.constant 4 : index
    %c0_10 = arith.constant 0 : index
    %8 = vector.load %arg2[%c4, %c0_10] : memref<5x128xf32, #tpu.memory_space<vmem>>, vector<1x128xf32>
    %cst = arith.constant dense<0.000000e+00> : vector<16x128xf32>
    %9 = tpu.matmul %0, %1, %cst {dimension_numbers = #tpu.dot_dimension_numbers<[1], [1], [0], [0], [0, 0, 1, 0], [], []>} : vector<16x128xf32>, vector<128x128xf32>, vector<16x128xf32> -> vector<16x128xf32>
    %10 = vector.broadcast %4 : vector<1x128xf32> to vector<16x128xf32>
    %11 = arith.addf %9, %10 : vector<16x128xf32>
    %cst_11 = arith.constant 0.000000e+00 : f32
    %12 = vector.broadcast %cst_11 : f32 to vector<16x128xf32>
    %13 = arith.maximumf %11, %12 : vector<16x128xf32>
    %cst_12 = arith.constant dense<0.000000e+00> : vector<16x128xf32>
    %14 = tpu.matmul %13, %2, %cst_12 {dimension_numbers = #tpu.dot_dimension_numbers<[1], [1], [0], [0], [0, 0, 1, 0], [], []>} : vector<16x128xf32>, vector<128x128xf32>, vector<16x128xf32> -> vector<16x128xf32>
    %15 = vector.broadcast %5 : vector<1x128xf32> to vector<16x128xf32>
    %16 = arith.addf %14, %15 : vector<16x128xf32>
    %cst_13 = arith.constant 0.000000e+00 : f32
    %17 = vector.broadcast %cst_13 : f32 to vector<16x128xf32>
    %18 = arith.maximumf %16, %17 : vector<16x128xf32>
    %cst_14 = arith.constant dense<0.000000e+00> : vector<16x128xf32>
    %19 = tpu.matmul %18, %3, %cst_14 {dimension_numbers = #tpu.dot_dimension_numbers<[1], [1], [0], [0], [0, 0, 1, 0], [], []>} : vector<16x128xf32>, vector<128x128xf32>, vector<16x128xf32> -> vector<16x128xf32>
    %20 = vector.broadcast %6 : vector<1x128xf32> to vector<16x128xf32>
    %21 = arith.addf %19, %20 : vector<16x128xf32>
    %22 = arith.addf %0, %21 : vector<16x128xf32>
    %cst_15 = arith.constant dense<0.000000e+00> : vector<16xf32>
    %23 = vector.multi_reduction <add>, %22, %cst_15 [1] : vector<16x128xf32> to vector<16xf32>
    %24 = vector.shape_cast %23 : vector<16xf32> to vector<16x1xf32>
    %cst_16 = arith.constant 1.280000e+02 : f32
    %25 = vector.broadcast %cst_16 : f32 to vector<16x1xf32>
    %26 = arith.divf %24, %25 : vector<16x1xf32>
    %27 = vector.broadcast %26 : vector<16x1xf32> to vector<16x128xf32>
    %28 = arith.subf %22, %27 : vector<16x128xf32>
    %29 = arith.mulf %28, %28 : vector<16x128xf32>
    %cst_17 = arith.constant dense<0.000000e+00> : vector<16xf32>
    %30 = vector.multi_reduction <add>, %29, %cst_17 [1] : vector<16x128xf32> to vector<16xf32>
    %31 = vector.shape_cast %30 : vector<16xf32> to vector<16x1xf32>
    %cst_18 = arith.constant 1.280000e+02 : f32
    %32 = vector.broadcast %cst_18 : f32 to vector<16x1xf32>
    %33 = arith.divf %31, %32 : vector<16x1xf32>
    %34 = vector.broadcast %26 : vector<16x1xf32> to vector<16x128xf32>
    %35 = arith.subf %22, %34 : vector<16x128xf32>
    %cst_19 = arith.constant 9.99999974E-6 : f32
    %36 = vector.broadcast %cst_19 : f32 to vector<16x1xf32>
    %37 = arith.addf %33, %36 : vector<16x1xf32>
    %38 = math.rsqrt %37 : vector<16x1xf32>
    %39 = vector.broadcast %38 : vector<16x1xf32> to vector<16x128xf32>
    %40 = arith.mulf %35, %39 : vector<16x128xf32>
    %41 = vector.broadcast %7 : vector<1x128xf32> to vector<16x128xf32>
    %42 = arith.mulf %40, %41 : vector<16x128xf32>
    %43 = vector.broadcast %8 : vector<1x128xf32> to vector<16x128xf32>
    %44 = arith.addf %42, %43 : vector<16x128xf32>
    %c0_20 = arith.constant 0 : index
    %c0_21 = arith.constant 0 : index
    %45 = vector.load %arg3[%c0_20, %c0_21] : memref<16x128xf32, #tpu.memory_space<vmem>>, vector<16x128xf32>
    tpu.vector_store %arg3[%c0_20, %c0_21], %44 {strides = array<i32>} : memref<16x128xf32, #tpu.memory_space<vmem>>, vector<16x128xf32>,
    return
  }
}

</mosaic_0001>

<bundles_post_ra>
// kernel: tpu_custom_call.1
= control target key start
LH: loop header
LB: loop body
LE: loop exit
PB: predicated region body
PF: predicated region fallthrough
CT: control target
= control target key end

     0   :  { %8 = vsyncpa [#allocation3], 0  ;;  %s869_s0 = inlined_call_operand.hbm [shape: f32[16,128], index: 0, kind: input, shape index: {}]   ;;  %s870_s1 = inlined_call_operand.hbm [shape: f32[384,128], index: 1, kind: input, shape index: {}]   ;;  %s871_s2 = inlined_call_operand.hbm [shape: f32[5,128], index: 2, kind: input, shape index: {}]   ;;  %s872_s3 = inlined_call_operand.hbm [shape: f32[16,128], index: 3, kind: output, shape index: {}]  }
   0x1   :  { %9 = vsyncpa [#allocation6], 0 }
   0x2   :  { %10 = vsyncpa [#allocation4], 0  ;;  %s771_s12 = smov [#allocation5]   ;;  %s772_s14 = smov [#allocation2]  }
   0x3   :  { %s28_s13 = sshll.u32 %s771_s12, 4  ;;  %s16_s15 = sshll.u32 %s772_s14, 4  ;;  %s29_s13 = int_to_ptr.vmem [resolvable:$true] %s28_s13  ;;  %s797_s15 = int_to_ptr.vmem [resolvable:$true] %s16_s15 }
   0x4   :  { %s677_s18 = scalar_lea.hbm %s870_s1, 6144 }
   0x5   :  { %p678_p0 = scmp.ne.s32.totalorder %s870_s1, %s677_s18  ;;  %p681_p1 = scmp.lt.u32.totalorder %s677_s18, %s870_s1 }
   0x7   :  { %p683_p2 = pnand %p681_p1, %p678_p0 }
   0x9   :  { %686 = shalt.err (!%p683_p2)
}
   0xa   :  { %s687_s23 = scalar_lea.vmem %s29_s13, 6144  ;;  %p692_p4 = scmp.lt.s32.totalorder %s29_s13, %s29_s13 }
   0xb   :  { %p688_p3 = scmp.ne.s32.totalorder %s29_s13, %s687_s23  ;;  %p693_p5 = scmp.lt.s32.totalorder %s687_s23, %s687_s23 }
   0xd   :  { %p694_p6 = por %p693_p5, %p692_p4 }
   0xf   :  { %p695_p7 = pnand %p694_p6, %p688_p3 }
  0x11   :  { %698 = shalt.err (!%p695_p7)
}
  0x12   :  { %s773_s24 = smov 128   ;;  %s774_s25 = smov 8  }
  0x13   :  { %34 = dma.hbm_to_vmem [thread:$0]  %s870_s1, 6144, %s29_s13, [#allocation6], %s773_s24, %s773_s24, %s774_s25  }
  0x14   :  { %s699_s30 = scalar_lea.hbm %s869_s0, 256 }
  0x15   :  { %p700_p8 = scmp.ne.s32.totalorder %s869_s0, %s699_s30  ;;  %p703_p9 = scmp.lt.u32.totalorder %s699_s30, %s869_s0 }
  0x17   :  { %p705_p10 = pnand %p703_p9, %p700_p8 }
  0x19   :  { %708 = shalt.err (!%p705_p10)
}
  0x1a   :  { %s709_s8 = scalar_lea.vmem %s797_s15, 256  ;;  %p714_p12 = scmp.lt.s32.totalorder %s797_s15, %s797_s15 }
  0x1b   :  { %p710_p11 = scmp.ne.s32.totalorder %s797_s15, %s709_s8  ;;  %p715_p13 = scmp.lt.s32.totalorder %s709_s8, %s709_s8 }
  0x1d   :  { %p716_p0 = por %p715_p13, %p714_p12 }
  0x1f   :  { %p717_p1 = pnand %p716_p0, %p710_p11 }
  0x21   :  { %720 = shalt.err (!%p717_p1)
}
  0x22   :  { %22 = dma.hbm_to_vmem [thread:$0]  %s869_s0, 256, %s797_s15, [#allocation3], %s773_s24, %s773_s24, %s774_s25  }
  0x23   :  { %s775_s10 = smov [#allocation7]   ;;  %s721_s14 = scalar_lea.hbm %s871_s2, 128 }
  0x24   :  { %s41_s11 = sshll.u32 %s775_s10, 4  ;;  %p722_p2 = scmp.ne.s32.totalorder %s871_s2, %s721_s14  ;;  %s42_s11 = int_to_ptr.vmem [resolvable:$true] %s41_s11 }
  0x25   :  { %p725_p3 = scmp.lt.u32.totalorder %s721_s14, %s871_s2 }
  0x27   :  { %p727_p4 = pnand %p725_p3, %p722_p2 }
  0x29   :  { %730 = shalt.err (!%p727_p4)
}
  0x2a   :  { %s731_s20 = scalar_lea.vmem %s42_s11, 128  ;;  %p736_p6 = scmp.lt.s32.totalorder %s42_s11, %s42_s11 }
  0x2b   :  { %p732_p5 = scmp.ne.s32.totalorder %s42_s11, %s731_s20  ;;  %p737_p7 = scmp.lt.s32.totalorder %s731_s20, %s731_s20 }
  0x2d   :  { %p738_p8 = por %p737_p7, %p736_p6 }
  0x2f   :  { %p739_p9 = pnand %p738_p8, %p732_p5 }
  0x31   :  { %742 = shalt.err (!%p739_p9)
}
  0x32   :  { %44 = dma.hbm_to_vmem [thread:$0]  %s871_s2, 128, %s42_s11, [#allocation6]  }
  0x33   :  { %765 = dma.done.wait [#allocation3], 256  }
  0x34   :  { %766 = vsyncadd [#allocation3], 4294967040 }
  0x35   :  { %767 = dma.done.wait [#allocation6], 6272  }
  0x36   :  { %768 = vsyncadd [#allocation6], 4294961024  ;;  %v56_v0 = vld [vmem:[#allocation5] sm:$0xff]  ;;  %v57_v1 = vld [vmem:[#allocation5 + $0x8] sm:$0xff]  ;;  %s776_s2 = smov [#allocation8]  }
  0x37   :  { %v58_v2 = vld [vmem:[#allocation5 + $0x10] sm:$0xff]  ;;  %v571_v3 = vpack.c.bf16 %v57_v1, %v56_v0  ;;  %v59_v4 = vld [vmem:[#allocation5 + $0x18] sm:$0xff]  ;;  %v60_v6 = vld [vmem:[#allocation5 + $0x20] sm:$0xff]  ;;  %s394_s21 = sshll.u32 %s776_s2, 4  ;;  %s395_s21 = int_to_ptr.vmem [resolvable:$true] %s394_s21 }
  0x38   :  { %v575_v5 = vpack.c.bf16 %v59_v4, %v58_v2  ;;  %v61_v7 = vld [vmem:[#allocation5 + $0x28] sm:$0xff]  ;;  %v846_v8 = vld [vmem:[#allocation2] sm:$0xff]  ;;  %v72_v9 = vld [vmem:[#allocation5 + $0x80] sm:$0xff]  ;;  %s743_s22 = scalar_lea.vmem %s395_s21, 256  ;;  %p748_p11 = scmp.lt.s32.totalorder %s395_s21, %s395_s21 }
  0x39   :  { %572 = vmatprep.subr.bf16.mxu0 %v571_v3  ;;  %498 = vmatprep.mubr.f32.mxu0 %v846_v8  ;;  %v73_v10 = vld [vmem:[#allocation5 + $0x88] sm:$0xff]  ;;  %v74_v11 = vld [vmem:[#allocation5 + $0x90] sm:$0xff]  ;;  %v75_v13 = vld [vmem:[#allocation5 + $0x98] sm:$0xff]  ;;  %v579_v15 = vpack.c.bf16 %v61_v7, %v60_v6  ;;  %p744_p10 = scmp.ne.s32.totalorder %s395_s21, %s743_s22  ;;  %p749_p12 = scmp.lt.s32.totalorder %s743_s22, %s743_s22 }
  0x3a   :  { %574 = vmatpush3.bf16.xpose.msra.mxu0 %v571_v3  ;;  %v603_v12 = vpack.c.bf16 %v73_v10, %v72_v9  ;;  %v607_v14 = vpack.c.bf16 %v75_v13, %v74_v11  ;;  %v76_v16 = vld [vmem:[#allocation5 + $0xa0] sm:$0xff]  ;;  %v77_v17 = vld [vmem:[#allocation5 + $0xa8] sm:$0xff]  ;;  %v62_v18 = vld [vmem:[#allocation5 + $0x30] sm:$0xff] }
  0x3b   :  { %576 = vmatprep.subr.bf16.mxu0 %v575_v5  ;;  %v63_v19 = vld [vmem:[#allocation5 + $0x38] sm:$0xff]  ;;  %v611_v20 = vpack.c.bf16 %v77_v17, %v76_v16  ;;  %v78_v22 = vld [vmem:[#allocation5 + $0xb0] sm:$0xff]  ;;  %v64_v24 = vld [vmem:[#allocation5 + $0x40] sm:$0xff]  ;;  %p750_p13 = por %p749_p12, %p748_p11 }
  0x3c   :  { %604 = vmatprep.subr.bf16.mxu1 %v603_v12  ;;  %v583_v21 = vpack.c.bf16 %v63_v19, %v62_v18  ;;  %v79_v23 = vld [vmem:[#allocation5 + $0xb8] sm:$0xff]  ;;  %v65_v25 = vld [vmem:[#allocation5 + $0x48] sm:$0xff]  ;;  %v80_v28 = vld [vmem:[#allocation5 + $0xc0] sm:$0xff] }
  0x3d   :  { %606 = vmatpush3.bf16.xpose.msra.mxu1 %v603_v12  ;;  %v615_v26 = vpack.c.bf16 %v79_v23, %v78_v22  ;;  %v587_v27 = vpack.c.bf16 %v65_v25, %v64_v24  ;;  %v81_v29 = vld [vmem:[#allocation5 + $0xc8] sm:$0xff]  ;;  %v66_v30 = vld [vmem:[#allocation5 + $0x50] sm:$0xff]  ;;  %v67_v31 = vld [vmem:[#allocation5 + $0x58] sm:$0xff]  ;;  %p751_p0 = pnand %p750_p13, %p744_p10 }
  0x3e   :  { %608 = vmatprep.subr.bf16.mxu1 %v607_v14  ;;  %v619_v32 = vpack.c.bf16 %v81_v29, %v80_v28  ;;  %v591_v33 = vpack.c.bf16 %v67_v31, %v66_v30  ;;  %v82_v34 = vld [vmem:[#allocation5 + $0xd0] sm:$0xff]  ;;  %v83_v35 = vld [vmem:[#allocation5 + $0xd8] sm:$0xff]  ;;  %v68_v36 = vld [vmem:[#allocation5 + $0x60] sm:$0xff] }
  0x3f   :  { %v69_v37 = vld [vmem:[#allocation5 + $0x68] sm:$0xff]  ;;  %v623_v38 = vpack.c.bf16 %v83_v35, %v82_v34  ;;  %v84_v40 = vld [vmem:[#allocation5 + $0xe0] sm:$0xff]  ;;  %v70_v42 = vld [vmem:[#allocation5 + $0x70] sm:$0xff] }
  0x40   :  { %v595_v39 = vpack.c.bf16 %v69_v37, %v68_v36  ;;  %v85_v41 = vld [vmem:[#allocation5 + $0xe8] sm:$0xff]  ;;  %v71_v43 = vld [vmem:[#allocation5 + $0x78] sm:$0xff]  ;;  %v86_v46 = vld [vmem:[#allocation5 + $0xf0] sm:$0xff] }
  0x41   :  { %v627_v44 = vpack.c.bf16 %v85_v41, %v84_v40  ;;  %v599_v45 = vpack.c.bf16 %v71_v43, %v70_v42  ;;  %v87_v47 = vld [vmem:[#allocation5 + $0xf8] sm:$0xff]  ;;  %v88_v50 = vld [vmem:[#allocation5 + $0x100] sm:$0xff]  ;;  %v89_v51 = vld [vmem:[#allocation5 + $0x108] sm:$0xff] }
  0x42   :  { %578 = vmatpush3.bf16.xpose.msra.mxu0 %v575_v5  ;;  %v631_v48 = vpack.c.bf16 %v87_v47, %v86_v46  ;;  %v849_v49 = vld [vmem:[#allocation2 + $0x8] sm:$0xff]  ;;  %v90_v52 = vld [vmem:[#allocation5 + $0x110] sm:$0xff]  ;;  %v635_v53 = vpack.c.bf16 %v89_v51, %v88_v50  ;;  %v92_v56 = vld [vmem:[#allocation5 + $0x120] sm:$0xff] }
  0x43   :  { %580 = vmatprep.subr.bf16.mxu0 %v579_v15  ;;  %v91_v54 = vld [vmem:[#allocation5 + $0x118] sm:$0xff]  ;;  %v93_v57 = vld [vmem:[#allocation5 + $0x128] sm:$0xff]  ;;  %v94_v59 = vld [vmem:[#allocation5 + $0x130] sm:$0xff] }
  0x44   :  { %v639_v55 = vpack.c.bf16 %v91_v54, %v90_v52  ;;  %v643_v58 = vpack.c.bf16 %v93_v57, %v92_v56  ;;  %v95_v60 = vld [vmem:[#allocation5 + $0x138] sm:$0xff]  ;;  %v96_v62 = vld [vmem:[#allocation5 + $0x140] sm:$0xff]  ;;  %v97_v63 = vld [vmem:[#allocation5 + $0x148] sm:$0xff] }
  0x45   :  { %610 = vmatpush3.bf16.xpose.msra.mxu1 %v607_v14  ;;  %v647_v61 = vpack.c.bf16 %v95_v60, %v94_v59  ;;  %v651_v0 = vpack.c.bf16 %v97_v63, %v96_v62  ;;  %v98_v1 = vld [vmem:[#allocation5 + $0x150] sm:$0xff]  ;;  %v99_v2 = vld [vmem:[#allocation5 + $0x158] sm:$0xff]  ;;  %v100_v4 = vld [vmem:[#allocation5 + $0x160] sm:$0xff] }
  0x46   :  { %612 = vmatprep.subr.bf16.mxu1 %v611_v20  ;;  %v655_v3 = vpack.c.bf16 %v99_v2, %v98_v1  ;;  %v101_v5 = vld [vmem:[#allocation5 + $0x168] sm:$0xff]  ;;  %v102_v7 = vld [vmem:[#allocation5 + $0x170] sm:$0xff]  ;;  %v103_v9 = vld [vmem:[#allocation5 + $0x178] sm:$0xff] }
  0x47   :  { %v659_v6 = vpack.c.bf16 %v101_v5, %v100_v4  ;;  %v663_v10 = vpack.c.bf16 %v103_v9, %v102_v7  ;;  %v407_v11 = vld [vmem:[#allocation7] ss:$0 sm:$0xff]  ;;  %v408_v18 = vld [vmem:[#allocation7 + $0x1] ss:$0 sm:$0xff]  ;;  %v409_v25 = vld [vmem:[#allocation7 + $0x2] ss:$0 sm:$0xff] }
  0x48   :  { %v410_v46 = vld [vmem:[#allocation7 + $0x3] ss:$0 sm:$0xff] }
  0x4a   :  { %582 = vmatpush3.bf16.xpose.msra.mxu0 %v579_v15 }
  0x4b   :  { %584 = vmatprep.subr.bf16.mxu0 %v583_v21 }
  0x4d   :  { %614 = vmatpush3.bf16.xpose.msra.mxu1 %v611_v20 }
  0x4e   :  { %616 = vmatprep.subr.bf16.mxu1 %v615_v26 }
  0x52   :  { %586 = vmatpush3.bf16.xpose.msra.mxu0 %v583_v21 }
  0x53   :  { %588 = vmatprep.subr.bf16.mxu0 %v587_v27 }
  0x55   :  { %618 = vmatpush3.bf16.xpose.msra.mxu1 %v615_v26 }
  0x56   :  { %620 = vmatprep.subr.bf16.mxu1 %v619_v32 }
  0x5a   :  { %590 = vmatpush3.bf16.xpose.msra.mxu0 %v587_v27 }
  0x5b   :  { %592 = vmatprep.subr.bf16.mxu0 %v591_v33 }
  0x5d   :  { %622 = vmatpush3.bf16.xpose.msra.mxu1 %v619_v32 }
  0x5e   :  { %624 = vmatprep.subr.bf16.mxu1 %v623_v38 }
  0x62   :  { %594 = vmatpush3.bf16.xpose.msra.mxu0 %v591_v33 }
  0x63   :  { %596 = vmatprep.subr.bf16.mxu0 %v595_v39 }
  0x65   :  { %626 = vmatpush3.bf16.xpose.msra.mxu1 %v623_v38 }
  0x66   :  { %628 = vmatprep.subr.bf16.mxu1 %v627_v44 }
  0x6a   :  { %598 = vmatpush3.bf16.xpose.msra.mxu0 %v595_v39 }
  0x6b   :  { %600 = vmatprep.subr.bf16.mxu0 %v599_v45 }
  0x6d   :  { %630 = vmatpush3.bf16.xpose.msra.mxu1 %v627_v44 }
  0x6e   :  { %632 = vmatprep.subr.bf16.mxu1 %v631_v48 }
  0x72   :  { %602 = vmatpush3.bf16.xpose.msra.mxu0 %v599_v45 }
  0x73   :  { %636 = vmatprep.subr.bf16.mxu0 %v635_v53 }
  0x75   :  { %634 = vmatpush3.bf16.xpose.msra.mxu1 %v631_v48  ;;  %v411_v48 = vld [vmem:[#allocation7 + $0x4] ss:$0 sm:$0xff] }
  0x79   :  { %499 = vmatmul.mubr.f32.vlgmr.msra.gmra.mrb[0].mxu0 %v849_v49 }
  0x7a   :  { %638 = vmatpush3.bf16.xpose.msra.mxu0 %v635_v53 }
  0x7b   :  { %640 = vmatprep.subr.bf16.mxu0 %v639_v55 }
  0x82   :  { %642 = vmatpush3.bf16.xpose.msra.mxu0 %v639_v55 }
  0x83   :  { %644 = vmatprep.subr.bf16.mxu0 %v643_v58 }
  0x8a   :  { %646 = vmatpush3.bf16.xpose.msra.mxu0 %v643_v58 }
  0x8b   :  { %648 = vmatprep.subr.bf16.mxu0 %v647_v61 }
  0x92   :  { %650 = vmatpush3.bf16.xpose.msra.mxu0 %v647_v61 }
  0x93   :  { %652 = vmatprep.subr.bf16.mxu0 %v651_v0 }
  0x9a   :  { %654 = vmatpush3.bf16.xpose.msra.mxu0 %v651_v0 }
  0x9b   :  { %656 = vmatprep.subr.bf16.mxu0 %v655_v3 }
  0xa2   :  { %658 = vmatpush3.bf16.xpose.msra.mxu0 %v655_v3 }
  0xa3   :  { %660 = vmatprep.subr.bf16.mxu0 %v659_v6 }
  0xaa   :  { %662 = vmatpush3.bf16.xpose.msra.mxu0 %v659_v6 }
  0xab   :  { %664 = vmatprep.subr.bf16.mxu0 %v663_v10 }
  0xb2   :  { %666 = vmatpush3.bf16.xpose.msra.mxu0 %v663_v10 }
 0x14c   :  { %v500_v12 = vpop.f32.mrb[0].mxu0 }
 0x14d   :  { %v185_v13 = vadd.f32 %v500_v12, %v407_v11  ;;  %v179_v14 = vpop.f32.mrb[1].mxu0 }
 0x14e   :  { %v180_v15 = vadd.f32 %v407_v11, %v179_v14 }
 0x14f   :  { %v189_v17 = vmax.f32 %v185_v13, 0.0 }
 0x150   :  { %v188_v16 = vmax.f32 %v180_v15, 0.0 }
 0x152   :  { %533 = vmatprep.mubr.f32.mxu1 %v188_v16 }
 0x153   :  { %534 = vmatmul.mubr.f32.vlgmr.msra.gmra.mrb[0].mxu1 %v189_v17 }
 0x226   :  { %v535_v19 = vpop.f32.mrb[0].mxu1 }
 0x227   :  { %v266_v20 = vadd.f32 %v535_v19, %v408_v18  ;;  %v260_v21 = vpop.f32.mrb[1].mxu1 }
 0x228   :  { %v261_v22 = vadd.f32 %v408_v18, %v260_v21 }
 0x229   :  { %v270_v24 = vmax.f32 %v266_v20, 0.0 }
 0x22a   :  { %v269_v23 = vmax.f32 %v261_v22, 0.0 }
 0x22c   :  { %568 = vmatprep.mubr.f32.mxu0 %v269_v23 }
 0x22d   :  { %569 = vmatmul.mubr.f32.vlgmr.msra.gmra.mrb[2].mxu0 %v270_v24 }
 0x300   :  { %v570_v26 = vpop.f32.mrb[2].mxu0 }
 0x301   :  { %v341_v27 = vpop.f32.mrb[3].mxu0  ;;  %v347_v29 = vadd.f32 %v570_v26, %v409_v25 }
 0x302   :  { %v342_v28 = vadd.f32 %v409_v25, %v341_v27 }
 0x303   :  { %v351_v31 = vadd.f32 %v347_v29, %v849_v49 }
 0x304   :  { %v350_v30 = vadd.f32 %v342_v28, %v846_v8 }
 0x306   :  { %352 = vadd.xlane.f32.xlu0 %v350_v30 }
 0x30a   :  { %354 = vadd.xlane.f32.xlu0 %v351_v31 }
 0x393   :  { %v353_v32 = vpop.xlane.xlu0 %352 }
 0x394   :  { %v357_v33 = vmul.f32 0.0078125, %v353_v32 }
 0x396   :  { %v359_v34 = vsub.f32 %v350_v30, %v357_v33 }
 0x397   :  { %v355_v35 = vpop.xlane.xlu0 %354 }
 0x398   :  { %v358_v36 = vmul.f32 0.0078125, %v355_v35  ;;  %v361_v37 = vmul.f32 %v359_v34, %v359_v34 }
 0x39a   :  { %v360_v38 = vsub.f32 %v351_v31, %v358_v36  ;;  %363 = vadd.xlane.f32.xlu1 %v361_v37 }
 0x39c   :  { %v362_v39 = vmul.f32 %v360_v38, %v360_v38 }
 0x39e   :  { %365 = vadd.xlane.f32.xlu1 %v362_v39 }
 0x427   :  { %v364_v40 = vpop.xlane.xlu1 %363 }
 0x428   :  { %v367_v41 = vmul.f32 0.0078125, %v364_v40 }
 0x42a   :  { %v369_v42 = vadd.f32 1e-05, %v367_v41 }
 0x42b   :  { %v366_v43 = vpop.xlane.xlu1 %365 }
 0x42c   :  { %673 = vrsqrt.f32 %v369_v42  ;;  %v368_v8 = vmul.f32 0.0078125, %v366_v43 }
 0x42e   :  { %v370_v44 = vadd.f32 1e-05, %v368_v8 }
 0x430   :  { %675 = vrsqrt.f32 %v370_v44 }
 0x436   :  { %v674_v45 = vpop.eup %673 }
 0x437   :  { %v373_v47 = vmul.f32 %v674_v45, %v359_v34 }
 0x439   :  { %v379_v49 = vmul.f32 %v410_v46, %v373_v47 }
 0x43a   :  { %v676_v50 = vpop.eup %675 }
 0x43b   :  { %v374_v51 = vmul.f32 %v676_v50, %v360_v38  ;;  %v385_v52 = vadd.f32 %v411_v48, %v379_v49 }
 0x43d   :  { %v380_v53 = vmul.f32 %v410_v46, %v374_v51  ;;  %387 = vst [vmem:[#allocation8] sm:$0xff] %v385_v52 }
 0x43f   :  { %v386_v54 = vadd.f32 %v411_v48, %v380_v53 }
 0x441   :  { %388 = vst [vmem:[#allocation8 + $0x8] sm:$0xff] %v386_v54 }
 0x442   :  { %754 = shalt.err (!%p751_p0)
}
 0x443   :  { %s755_s27 = scalar_lea.hbm %s872_s3, 256 }
 0x444   :  { %p756_p1 = scmp.ne.s32.totalorder %s872_s3, %s755_s27  ;;  %p759_p2 = scmp.lt.u32.totalorder %s755_s27, %s872_s3 }
 0x446   :  { %p761_p3 = pnand %p759_p2, %p756_p1 }
 0x448   :  { %764 = shalt.err (!%p761_p3)
}
 0x449   :  { %400 = dma.vmem_to_hbm [thread:$0]  %s395_s21, 256, %s872_s3, [#allocation4], %s773_s24, %s773_s24, %s774_s25  }
 0x44a   :  { %769 = dma.done.wait [#allocation4], 256  }
 0x44b   :  { %770 = vsyncadd [#allocation4], 4294967040 }
 0x44c   :  { %404 = vsyncpa [#allocation3], 1 }
 0x44d   :  { %405 = vsyncpa [#allocation6], 1 }
 0x44e   :  { %406 = vsyncpa [#allocation4], 1 }

</bundles_post_ra>
